<compile_context>
chip_gen: v5e
topology: v5e:2x2
jax: 0.10.0
libtpu: 0.0.40
codegen_flags: <defaults>
</compile_context>

<pallas_src>
import functools

import jax
import jax.numpy as jnp
from jax.experimental import pallas as pl
from jax.experimental.pallas import tpu as pltpu

SEQ = 8
BATCH = 2
VOCAB = 50         # emb_size (demo-sized)
HIDDEN = 32        # hidden_size (demo-sized)
N_CATEGORY = 4
N_LSTM = 2         # module hard-codes n_lstm=2
DROP_P = 0.8       # F.dropout(p=0.8), training=True (PyTorch default)


def _vocab_pad(vocab):
  return max(128, ((vocab + 127) // 128) * 128)


def _lstm_net_kernel(tok_ref, w_ref, fc_ref, u_ref, out_ref):
  """Fused embedding + skewed/fused 2-layer LSTM + FC + dropout + log_softmax."""
  batch, n_cat = out_ref.shape
  hidden = w_ref.shape[1] // 8
  h2 = 2 * hidden
  vocab_pad = w_ref.shape[0] - h2 - 8
  seq = tok_ref.shape[0] // batch

  # --- fused embedding gather + layer-0 input projection: one MXU pass.
  # Table rows >= VOCAB are zero, so the lane padding of the one-hot is inert.
  tok = tok_ref[...]                                              # [seq*batch, 1] i32
  vocab_iota = jax.lax.broadcasted_iota(jnp.int32, (seq * batch, vocab_pad), 1)
  onehot = (vocab_iota == tok).astype(jnp.float32)                # [seq*batch, Vpad]
  xg_all = jnp.dot(onehot, w_ref[0:vocab_pad, :],
                   preferred_element_type=jnp.float32)            # [seq*batch, 8H]

  w_rec = w_ref[vocab_pad:vocab_pad + h2, :]                      # [2H, 8H]
  b1_row = w_ref[vocab_pad + h2:vocab_pad + h2 + 1, :]            # [1, 8H]

  def combined_cell(gates, c):
    # gates: [batch, 8H] with gate-major, layer-interleaved columns
    # [i0 i1 | f0 f1 | g0 g1 | o0 o1]; c: [batch, 2H] = [c0 | c1].
    # One stacked tanh push gives both the sigmoids (tanh identity) and the g tanh.
    t = jnp.tanh(jnp.concatenate([0.5 * gates, gates], axis=0))   # [2*batch, 8H]
    sig = 0.5 * (t[:batch, :] + 1.0)
    th = t[batch:, :]
    i_g = sig[:, 0 * h2:1 * h2]
    f_g = sig[:, 1 * h2:2 * h2]
    g_g = th[:, 2 * h2:3 * h2]
    o_g = sig[:, 3 * h2:4 * h2]
    c_new = f_g * c + i_g * g_g
    h_new = o_g * jnp.tanh(c_new)
    return h_new, c_new                                           # both [batch, 2H]

  # Mask keeping only the layer-0 half (zeros the nonexistent layer-1 "step -1").
  layer0_mask = (jax.lax.broadcasted_iota(jnp.int32, (1, h2), 1)
                 < hidden).astype(jnp.float32)

  # t = 0: h == 0 so the recurrent dot vanishes; gates come straight from the table.
  h, c = combined_cell(xg_all[0:batch, :], jnp.zeros((batch, h2), jnp.float32))
  h = h * layer0_mask
  c = c * layer0_mask

  # Skewed steady state: iteration t advances layer-0 to step t and layer-1 to step
  # t-1 off a single MXU dot (both only read h0(t-1), h1(t-2)).  Fully unrolled
  # (seq static) so every slice is static and the scheduler can overlap iterations.
  for t in range(1, seq):
    gates = (jnp.dot(h, w_rec, preferred_element_type=jnp.float32)
             + xg_all[t * batch:(t + 1) * batch, :])
    h, c = combined_cell(gates, c)

  # Epilogue: layer-1 step seq-1 (the layer-0 half of this cell is discarded).
  gates = jnp.dot(h, w_rec, preferred_element_type=jnp.float32) + b1_row
  h, _ = combined_cell(gates, c)
  h1_last = h[:, hidden:h2]                                       # [batch, H]

  # fc2 on the last timestep's top-layer hidden state.
  logits = (jnp.dot(h1_last, fc_ref[0:hidden, :],
                    preferred_element_type=jnp.float32)
            + fc_ref[hidden:hidden + 1, :])                       # [batch, n_cat]

  # Dropout p=0.8 (training=True semantics, as F.dropout defaults); uniforms are
  # drawn host-side.  TODO(synk): torch's dropout RNG stream cannot be bit-matched.
  keep = u_ref[...] < (1.0 - DROP_P)
  dropped = jnp.where(keep, logits * (1.0 / (1.0 - DROP_P)), 0.0)

  # LogSoftmax(dim=-1)
  m = jnp.max(dropped, axis=-1, keepdims=True)
  lse = m + jnp.log(jnp.sum(jnp.exp(dropped - m), axis=-1, keepdims=True))
  out_ref[...] = dropped - lse


def lstm_net_forward(x_tokens, packed, dropout_u):
  """x_tokens: [seq, batch] int32 ids; dropout_u: [batch, n_category] U[0,1) draws.

  Returns [batch, n_category] log-probs."""
  seq, batch = x_tokens.shape
  n_cat = packed["fc_slab"].shape[1]
  vmem = functools.partial(pl.BlockSpec, memory_space=pltpu.MemorySpace.VMEM)
  return pl.pallas_call(
      _lstm_net_kernel,
      out_shape=jax.ShapeDtypeStruct((batch, n_cat), jnp.float32),
      in_specs=[vmem(), vmem(), vmem(), vmem()],
      out_specs=vmem(),
  )(x_tokens.reshape(seq * batch, 1).astype(jnp.int32),
    packed["w_slab"], packed["fc_slab"],
    dropout_u.astype(jnp.float32))


def init_raw_params(key):
  """Deterministic PyTorch-layout weights (nn.Embedding, 2x nn.LSTM layer, nn.Linear)."""
  ks = jax.random.split(key, 11)
  bound = 1.0 / (HIDDEN ** 0.5)
  u = lambda k, shape: jax.random.uniform(k, shape, jnp.float32, -bound, bound)
  return {
      "emb": jax.random.normal(ks[0], (VOCAB, HIDDEN), jnp.float32),
      "w_ih0": u(ks[1], (4 * HIDDEN, HIDDEN)), "w_hh0": u(ks[2], (4 * HIDDEN, HIDDEN)),
      "b_ih0": u(ks[3], (4 * HIDDEN,)), "b_hh0": u(ks[4], (4 * HIDDEN,)),
      "w_ih1": u(ks[5], (4 * HIDDEN, HIDDEN)), "w_hh1": u(ks[6], (4 * HIDDEN, HIDDEN)),
      "b_ih1": u(ks[7], (4 * HIDDEN,)), "b_hh1": u(ks[8], (4 * HIDDEN,)),
      "fc_w": u(ks[9], (N_CATEGORY, HIDDEN)), "fc_b": u(ks[10], (N_CATEGORY,)),
  }


def _interleave_gates(l0, l1, hidden):
  """[rows,4H]x2 (torch gate order i,f,g,o) -> [rows,8H] gate-major layer-interleaved."""
  cols = []
  for g in range(4):
    cols.append(l0[:, g * hidden:(g + 1) * hidden])
    cols.append(l1[:, g * hidden:(g + 1) * hidden])
  return jnp.concatenate(cols, axis=1)


def pack_params(raw):
  """Coalesce all operands into two VMEM slabs (one DMA each)."""
  H = HIDDEN
  vpad = _vocab_pad(VOCAB)
  b0 = raw["b_ih0"] + raw["b_hh0"]                                 # [4H]
  b1 = raw["b_ih1"] + raw["b_hh1"]                                 # [4H]

  # Rows 0:vpad -- fused embedding/layer-0-input table (+ b0); b1 in layer-1 cols.
  tab_l0 = raw["emb"] @ raw["w_ih0"].T + b0[None, :]               # [V, 4H]
  tab_l1 = jnp.broadcast_to(b1[None, :], (VOCAB, 4 * H))           # [V, 4H]
  table = _interleave_gates(tab_l0, tab_l1, H)                     # [V, 8H]
  table = jnp.concatenate(
      [table, jnp.zeros((vpad - VOCAB, 8 * H), jnp.float32)], axis=0)

  # Rows vpad:vpad+2H -- combined recurrent weight [[W_hh0^T, W_ih1^T],[0, W_hh1^T]].
  w_rec = jnp.concatenate([
      _interleave_gates(raw["w_hh0"].T, raw["w_ih1"].T, H),
      _interleave_gates(jnp.zeros((H, 4 * H), jnp.float32), raw["w_hh1"].T, H),
  ], axis=0)                                                       # [2H, 8H]

  # Rows vpad+2H:vpad+2H+8 -- layer-1 bias row (used by the skew epilogue) + padding.
  b1_row = _interleave_gates(jnp.zeros((1, 4 * H), jnp.float32), b1[None, :], H)
  b1_blk = jnp.concatenate([b1_row, jnp.zeros((7, 8 * H), jnp.float32)], axis=0)

  w_slab = jnp.concatenate([table, w_rec, b1_blk], axis=0)         # [vpad+2H+8, 8H]

  # fc slab: rows 0:H = W^T, row H = bias, rest zero padding.
  fc_slab = jnp.concatenate([
      raw["fc_w"].T,                                               # [H, n_cat]
      raw["fc_b"][None, :],                                        # [1, n_cat]
      jnp.zeros((7, N_CATEGORY), jnp.float32),
  ], axis=0)                                                       # [H+8, n_cat]

  return {"w_slab": w_slab, "fc_slab": fc_slab}


def reference_forward(x_tokens, raw, dropout_u):
  """Pure-JAX mirror of LSTMNet.forward (same dropout draws), for validation."""
  seq, batch = x_tokens.shape
  e_out = raw["emb"][x_tokens]                                     # [seq, batch, H]

  def cell(x, h, c, w_ih, w_hh, b_ih, b_hh):
    g = x @ w_ih.T + h @ w_hh.T + b_ih + b_hh
    i, f, gg, o = jnp.split(g, 4, axis=-1)
    c = jax.nn.sigmoid(f) * c + jax.nn.sigmoid(i) * jnp.tanh(gg)
    return jax.nn.sigmoid(o) * jnp.tanh(c), c

  z = jnp.zeros((batch, HIDDEN), jnp.float32)
  h0, c0, h1, c1 = z, z, z, z
  for t in range(seq):
    h0, c0 = cell(e_out[t], h0, c0,
                  raw["w_ih0"], raw["w_hh0"], raw["b_ih0"], raw["b_hh0"])
    h1, c1 = cell(h0, h1, c1,
                  raw["w_ih1"], raw["w_hh1"], raw["b_ih1"], raw["b_hh1"])
  logits = h1 @ raw["fc_w"].T + raw["fc_b"]
  keep = dropout_u < (1.0 - DROP_P)
  dropped = jnp.where(keep, logits * (1.0 / (1.0 - DROP_P)), 0.0)
  return jax.nn.log_softmax(dropped, axis=-1)


if __name__ == "__main__":
  key = jax.random.PRNGKey(0)
  pkey, xkey, dkey = jax.random.split(key, 3)
  raw = init_raw_params(pkey)
  packed = pack_params(raw)

  # x: [seq, batch] int32 token ids (seq-first, as nn.LSTM expects).
  x = jax.random.randint(xkey, (SEQ, BATCH), 0, VOCAB, dtype=jnp.int32)
  # Dropout draws generated host-side (training=True semantics of F.dropout).
  u = jax.random.uniform(dkey, (BATCH, N_CATEGORY), jnp.float32)

  out = jax.block_until_ready(lstm_net_forward(x, packed, u))
  ref = jax.block_until_ready(reference_forward(x, raw, u))

  assert out.shape == (BATCH, N_CATEGORY)
  assert bool(jnp.allclose(out, ref, atol=2e-3, rtol=2e-3)), (out, ref)
  print("KERNEL_OK")
</pallas_src>

<mosaic_0001>
module attributes {stable_mosaic.version = 11 : i64} {
  func.func @_lstm_net_kernel(%arg0: memref<16x1xi32, #tpu.memory_space<vmem>>, %arg1: memref<200x256xf32, #tpu.memory_space<vmem>>, %arg2: memref<40x4xf32, #tpu.memory_space<vmem>>, %arg3: memref<2x4xf32, #tpu.memory_space<vmem>>, %arg4: memref<2x4xf32, #tpu.memory_space<vmem>>) attributes {dimension_semantics = [], scalar_prefetch = 0 : i64, scratch_operands = 0 : i64, tpu.core_type = #tpu.core_type<tc>} {
    %c0 = arith.constant 0 : index
    %c0_0 = arith.constant 0 : index
    %0 = vector.load %arg0[%c0, %c0_0] : memref<16x1xi32, #tpu.memory_space<vmem>>, vector<16x1xi32>
    %1 = tpu.iota {dimensions = array<i32: 1>} : vector<16x128xi32>
    %2 = vector.broadcast %0 : vector<16x1xi32> to vector<16x128xi32>
    %3 = arith.cmpi eq, %1, %2 : vector<16x128xi32>
    %4 = arith.extui %3 : vector<16x128xi1> to vector<16x128xi32>
    %5 = arith.sitofp %4 : vector<16x128xi32> to vector<16x128xf32>
    %c0_1 = arith.constant 0 : index
    %c0_2 = arith.constant 0 : index
    %6 = vector.load %arg1[%c0_1, %c0_2] : memref<200x256xf32, #tpu.memory_space<vmem>>, vector<128x256xf32>
    %cst = arith.constant dense<0.000000e+00> : vector<16x256xf32>
    %7 = tpu.matmul %5, %6, %cst {dimension_numbers = #tpu.dot_dimension_numbers<[1], [0], [0], [1], [0, 0, 1, 1], [], []>} : vector<16x128xf32>, vector<128x256xf32>, vector<16x256xf32> -> vector<16x256xf32>
    %c128 = arith.constant 128 : index
    %c0_3 = arith.constant 0 : index
    %8 = vector.load %arg1[%c128, %c0_3] : memref<200x256xf32, #tpu.memory_space<vmem>>, vector<64x256xf32>
    %c192 = arith.constant 192 : index
    %c0_4 = arith.constant 0 : index
    %9 = vector.load %arg1[%c192, %c0_4] : memref<200x256xf32, #tpu.memory_space<vmem>>, vector<1x256xf32>
    %10 = tpu.iota {dimensions = array<i32: 1>} : vector<1x64xi32>
    %c32_i32 = arith.constant 32 : i32
    %11 = vector.broadcast %c32_i32 : i32 to vector<1x64xi32>
    %12 = arith.cmpi slt, %10, %11 : vector<1x64xi32>
    %13 = arith.extui %12 : vector<1x64xi1> to vector<1x64xi32>
    %14 = arith.sitofp %13 : vector<1x64xi32> to vector<1x64xf32>
    %15 = vector.extract_strided_slice %7 {offsets = [0, 0], sizes = [2, 256], strides = [1, 1]} : vector<16x256xf32> to vector<2x256xf32>
    %cst_5 = arith.constant 0.000000e+00 : f32
    %16 = vector.broadcast %cst_5 : f32 to vector<2x64xf32>
    %cst_6 = arith.constant 5.000000e-01 : f32
    %17 = vector.broadcast %cst_6 : f32 to vector<2x256xf32>
    %18 = arith.mulf %17, %15 : vector<2x256xf32>
    %19 = tpu.concatenate %18, %15 in 0 : vector<2x256xf32>, vector<2x256xf32> -> vector<4x256xf32>
    %20 = math.tanh %19 : vector<4x256xf32>
    %21 = vector.extract_strided_slice %20 {offsets = [0, 0], sizes = [2, 256], strides = [1, 1]} : vector<4x256xf32> to vector<2x256xf32>
    %cst_7 = arith.constant 1.000000e+00 : f32
    %22 = vector.broadcast %cst_7 : f32 to vector<2x256xf32>
    %23 = arith.addf %21, %22 : vector<2x256xf32>
    %cst_8 = arith.constant 5.000000e-01 : f32
    %24 = vector.broadcast %cst_8 : f32 to vector<2x256xf32>
    %25 = arith.mulf %24, %23 : vector<2x256xf32>
    %26 = vector.extract_strided_slice %20 {offsets = [2, 0], sizes = [2, 256], strides = [1, 1]} : vector<4x256xf32> to vector<2x256xf32>
    %27 = vector.extract_strided_slice %25 {offsets = [0, 0], sizes = [2, 64], strides = [1, 1]} : vector<2x256xf32> to vector<2x64xf32>
    %28 = vector.extract_strided_slice %25 {offsets = [0, 64], sizes = [2, 64], strides = [1, 1]} : vector<2x256xf32> to vector<2x64xf32>
    %29 = vector.extract_strided_slice %26 {offsets = [0, 128], sizes = [2, 64], strides = [1, 1]} : vector<2x256xf32> to vector<2x64xf32>
    %30 = vector.extract_strided_slice %25 {offsets = [0, 192], sizes = [2, 64], strides = [1, 1]} : vector<2x256xf32> to vector<2x64xf32>
    %31 = arith.mulf %28, %16 : vector<2x64xf32>
    %32 = arith.mulf %27, %29 : vector<2x64xf32>
    %33 = arith.addf %31, %32 : vector<2x64xf32>
    %34 = math.tanh %33 : vector<2x64xf32>
    %35 = arith.mulf %30, %34 : vector<2x64xf32>
    %36 = vector.broadcast %14 : vector<1x64xf32> to vector<2x64xf32>
    %37 = arith.mulf %35, %36 : vector<2x64xf32>
    %38 = vector.broadcast %14 : vector<1x64xf32> to vector<2x64xf32>
    %39 = arith.mulf %33, %38 : vector<2x64xf32>
    %cst_9 = arith.constant dense<0.000000e+00> : vector<2x256xf32>
    %40 = tpu.matmul %37, %8, %cst_9 {dimension_numbers = #tpu.dot_dimension_numbers<[1], [0], [0], [1], [0, 0, 1, 1], [], []>} : vector<2x64xf32>, vector<64x256xf32>, vector<2x256xf32> -> vector<2x256xf32>
    %41 = vector.extract_strided_slice %7 {offsets = [2, 0], sizes = [2, 256], strides = [1, 1]} : vector<16x256xf32> to vector<2x256xf32>
    %42 = arith.addf %40, %41 : vector<2x256xf32>
    %cst_10 = arith.constant 5.000000e-01 : f32
    %43 = vector.broadcast %cst_10 : f32 to vector<2x256xf32>
    %44 = arith.mulf %43, %42 : vector<2x256xf32>
    %45 = tpu.concatenate %44, %42 in 0 : vector<2x256xf32>, vector<2x256xf32> -> vector<4x256xf32>
    %46 = math.tanh %45 : vector<4x256xf32>
    %47 = vector.extract_strided_slice %46 {offsets = [0, 0], sizes = [2, 256], strides = [1, 1]} : vector<4x256xf32> to vector<2x256xf32>
    %cst_11 = arith.constant 1.000000e+00 : f32
    %48 = vector.broadcast %cst_11 : f32 to vector<2x256xf32>
    %49 = arith.addf %47, %48 : vector<2x256xf32>
    %cst_12 = arith.constant 5.000000e-01 : f32
    %50 = vector.broadcast %cst_12 : f32 to vector<2x256xf32>
    %51 = arith.mulf %50, %49 : vector<2x256xf32>
    %52 = vector.extract_strided_slice %46 {offsets = [2, 0], sizes = [2, 256], strides = [1, 1]} : vector<4x256xf32> to vector<2x256xf32>
    %53 = vector.extract_strided_slice %51 {offsets = [0, 0], sizes = [2, 64], strides = [1, 1]} : vector<2x256xf32> to vector<2x64xf32>
    %54 = vector.extract_strided_slice %51 {offsets = [0, 64], sizes = [2, 64], strides = [1, 1]} : vector<2x256xf32> to vector<2x64xf32>
    %55 = vector.extract_strided_slice %52 {offsets = [0, 128], sizes = [2, 64], strides = [1, 1]} : vector<2x256xf32> to vector<2x64xf32>
    %56 = vector.extract_strided_slice %51 {offsets = [0, 192], sizes = [2, 64], strides = [1, 1]} : vector<2x256xf32> to vector<2x64xf32>
    %57 = arith.mulf %54, %39 : vector<2x64xf32>
    %58 = arith.mulf %53, %55 : vector<2x64xf32>
    %59 = arith.addf %57, %58 : vector<2x64xf32>
    %60 = math.tanh %59 : vector<2x64xf32>
    %61 = arith.mulf %56, %60 : vector<2x64xf32>
    %cst_13 = arith.constant dense<0.000000e+00> : vector<2x256xf32>
    %62 = tpu.matmul %61, %8, %cst_13 {dimension_numbers = #tpu.dot_dimension_numbers<[1], [0], [0], [1], [0, 0, 1, 1], [], []>} : vector<2x64xf32>, vector<64x256xf32>, vector<2x256xf32> -> vector<2x256xf32>
    %63 = vector.extract_strided_slice %7 {offsets = [4, 0], sizes = [2, 256], strides = [1, 1]} : vector<16x256xf32> to vector<2x256xf32>
    %64 = arith.addf %62, %63 : vector<2x256xf32>
    %cst_14 = arith.constant 5.000000e-01 : f32
    %65 = vector.broadcast %cst_14 : f32 to vector<2x256xf32>
    %66 = arith.mulf %65, %64 : vector<2x256xf32>
    %67 = tpu.concatenate %66, %64 in 0 : vector<2x256xf32>, vector<2x256xf32> -> vector<4x256xf32>
    %68 = math.tanh %67 : vector<4x256xf32>
    %69 = vector.extract_strided_slice %68 {offsets = [0, 0], sizes = [2, 256], strides = [1, 1]} : vector<4x256xf32> to vector<2x256xf32>
    %cst_15 = arith.constant 1.000000e+00 : f32
    %70 = vector.broadcast %cst_15 : f32 to vector<2x256xf32>
    %71 = arith.addf %69, %70 : vector<2x256xf32>
    %cst_16 = arith.constant 5.000000e-01 : f32
    %72 = vector.broadcast %cst_16 : f32 to vector<2x256xf32>
    %73 = arith.mulf %72, %71 : vector<2x256xf32>
    %74 = vector.extract_strided_slice %68 {offsets = [2, 0], sizes = [2, 256], strides = [1, 1]} : vector<4x256xf32> to vector<2x256xf32>
    %75 = vector.extract_strided_slice %73 {offsets = [0, 0], sizes = [2, 64], strides = [1, 1]} : vector<2x256xf32> to vector<2x64xf32>
    %76 = vector.extract_strided_slice %73 {offsets = [0, 64], sizes = [2, 64], strides = [1, 1]} : vector<2x256xf32> to vector<2x64xf32>
    %77 = vector.extract_strided_slice %74 {offsets = [0, 128], sizes = [2, 64], strides = [1, 1]} : vector<2x256xf32> to vector<2x64xf32>
    %78 = vector.extract_strided_slice %73 {offsets = [0, 192], sizes = [2, 64], strides = [1, 1]} : vector<2x256xf32> to vector<2x64xf32>
    %79 = arith.mulf %76, %59 : vector<2x64xf32>
    %80 = arith.mulf %75, %77 : vector<2x64xf32>
    %81 = arith.addf %79, %80 : vector<2x64xf32>
    %82 = math.tanh %81 : vector<2x64xf32>
    %83 = arith.mulf %78, %82 : vector<2x64xf32>
    %cst_17 = arith.constant dense<0.000000e+00> : vector<2x256xf32>
    %84 = tpu.matmul %83, %8, %cst_17 {dimension_numbers = #tpu.dot_dimension_numbers<[1], [0], [0], [1], [0, 0, 1, 1], [], []>} : vector<2x64xf32>, vector<64x256xf32>, vector<2x256xf32> -> vector<2x256xf32>
    %85 = vector.extract_strided_slice %7 {offsets = [6, 0], sizes = [2, 256], strides = [1, 1]} : vector<16x256xf32> to vector<2x256xf32>
    %86 = arith.addf %84, %85 : vector<2x256xf32>
    %cst_18 = arith.constant 5.000000e-01 : f32
    %87 = vector.broadcast %cst_18 : f32 to vector<2x256xf32>
    %88 = arith.mulf %87, %86 : vector<2x256xf32>
    %89 = tpu.concatenate %88, %86 in 0 : vector<2x256xf32>, vector<2x256xf32> -> vector<4x256xf32>
    %90 = math.tanh %89 : vector<4x256xf32>
    %91 = vector.extract_strided_slice %90 {offsets = [0, 0], sizes = [2, 256], strides = [1, 1]} : vector<4x256xf32> to vector<2x256xf32>
    %cst_19 = arith.constant 1.000000e+00 : f32
    %92 = vector.broadcast %cst_19 : f32 to vector<2x256xf32>
    %93 = arith.addf %91, %92 : vector<2x256xf32>
    %cst_20 = arith.constant 5.000000e-01 : f32
    %94 = vector.broadcast %cst_20 : f32 to vector<2x256xf32>
    %95 = arith.mulf %94, %93 : vector<2x256xf32>
    %96 = vector.extract_strided_slice %90 {offsets = [2, 0], sizes = [2, 256], strides = [1, 1]} : vector<4x256xf32> to vector<2x256xf32>
    %97 = vector.extract_strided_slice %95 {offsets = [0, 0], sizes = [2, 64], strides = [1, 1]} : vector<2x256xf32> to vector<2x64xf32>
    %98 = vector.extract_strided_slice %95 {offsets = [0, 64], sizes = [2, 64], strides = [1, 1]} : vector<2x256xf32> to vector<2x64xf32>
    %99 = vector.extract_strided_slice %96 {offsets = [0, 128], sizes = [2, 64], strides = [1, 1]} : vector<2x256xf32> to vector<2x64xf32>
    %100 = vector.extract_strided_slice %95 {offsets = [0, 192], sizes = [2, 64], strides = [1, 1]} : vector<2x256xf32> to vector<2x64xf32>
    %101 = arith.mulf %98, %81 : vector<2x64xf32>
    %102 = arith.mulf %97, %99 : vector<2x64xf32>
    %103 = arith.addf %101, %102 : vector<2x64xf32>
    %104 = math.tanh %103 : vector<2x64xf32>
    %105 = arith.mulf %100, %104 : vector<2x64xf32>
    %cst_21 = arith.constant dense<0.000000e+00> : vector<2x256xf32>
    %106 = tpu.matmul %105, %8, %cst_21 {dimension_numbers = #tpu.dot_dimension_numbers<[1], [0], [0], [1], [0, 0, 1, 1], [], []>} : vector<2x64xf32>, vector<64x256xf32>, vector<2x256xf32> -> vector<2x256xf32>
    %107 = vector.extract_strided_slice %7 {offsets = [8, 0], sizes = [2, 256], strides = [1, 1]} : vector<16x256xf32> to vector<2x256xf32>
    %108 = arith.addf %106, %107 : vector<2x256xf32>
    %cst_22 = arith.constant 5.000000e-01 : f32
    %109 = vector.broadcast %cst_22 : f32 to vector<2x256xf32>
    %110 = arith.mulf %109, %108 : vector<2x256xf32>
    %111 = tpu.concatenate %110, %108 in 0 : vector<2x256xf32>, vector<2x256xf32> -> vector<4x256xf32>
    %112 = math.tanh %111 : vector<4x256xf32>
    %113 = vector.extract_strided_slice %112 {offsets = [0, 0], sizes = [2, 256], strides = [1, 1]} : vector<4x256xf32> to vector<2x256xf32>
    %cst_23 = arith.constant 1.000000e+00 : f32
    %114 = vector.broadcast %cst_23 : f32 to vector<2x256xf32>
    %115 = arith.addf %113, %114 : vector<2x256xf32>
    %cst_24 = arith.constant 5.000000e-01 : f32
    %116 = vector.broadcast %cst_24 : f32 to vector<2x256xf32>
    %117 = arith.mulf %116, %115 : vector<2x256xf32>
    %118 = vector.extract_strided_slice %112 {offsets = [2, 0], sizes = [2, 256], strides = [1, 1]} : vector<4x256xf32> to vector<2x256xf32>
    %119 = vector.extract_strided_slice %117 {offsets = [0, 0], sizes = [2, 64], strides = [1, 1]} : vector<2x256xf32> to vector<2x64xf32>
    %120 = vector.extract_strided_slice %117 {offsets = [0, 64], sizes = [2, 64], strides = [1, 1]} : vector<2x256xf32> to vector<2x64xf32>
    %121 = vector.extract_strided_slice %118 {offsets = [0, 128], sizes = [2, 64], strides = [1, 1]} : vector<2x256xf32> to vector<2x64xf32>
    %122 = vector.extract_strided_slice %117 {offsets = [0, 192], sizes = [2, 64], strides = [1, 1]} : vector<2x256xf32> to vector<2x64xf32>
    %123 = arith.mulf %120, %103 : vector<2x64xf32>
    %124 = arith.mulf %119, %121 : vector<2x64xf32>
    %125 = arith.addf %123, %124 : vector<2x64xf32>
    %126 = math.tanh %125 : vector<2x64xf32>
    %127 = arith.mulf %122, %126 : vector<2x64xf32>
    %cst_25 = arith.constant dense<0.000000e+00> : vector<2x256xf32>
    %128 = tpu.matmul %127, %8, %cst_25 {dimension_numbers = #tpu.dot_dimension_numbers<[1], [0], [0], [1], [0, 0, 1, 1], [], []>} : vector<2x64xf32>, vector<64x256xf32>, vector<2x256xf32> -> vector<2x256xf32>
    %129 = vector.extract_strided_slice %7 {offsets = [10, 0], sizes = [2, 256], strides = [1, 1]} : vector<16x256xf32> to vector<2x256xf32>
    %130 = arith.addf %128, %129 : vector<2x256xf32>
    %cst_26 = arith.constant 5.000000e-01 : f32
    %131 = vector.broadcast %cst_26 : f32 to vector<2x256xf32>
    %132 = arith.mulf %131, %130 : vector<2x256xf32>
    %133 = tpu.concatenate %132, %130 in 0 : vector<2x256xf32>, vector<2x256xf32> -> vector<4x256xf32>
    %134 = math.tanh %133 : vector<4x256xf32>
    %135 = vector.extract_strided_slice %134 {offsets = [0, 0], sizes = [2, 256], strides = [1, 1]} : vector<4x256xf32> to vector<2x256xf32>
    %cst_27 = arith.constant 1.000000e+00 : f32
    %136 = vector.broadcast %cst_27 : f32 to vector<2x256xf32>
    %137 = arith.addf %135, %136 : vector<2x256xf32>
    %cst_28 = arith.constant 5.000000e-01 : f32
    %138 = vector.broadcast %cst_28 : f32 to vector<2x256xf32>
    %139 = arith.mulf %138, %137 : vector<2x256xf32>
    %140 = vector.extract_strided_slice %134 {offsets = [2, 0], sizes = [2, 256], strides = [1, 1]} : vector<4x256xf32> to vector<2x256xf32>
    %141 = vector.extract_strided_slice %139 {offsets = [0, 0], sizes = [2, 64], strides = [1, 1]} : vector<2x256xf32> to vector<2x64xf32>
    %142 = vector.extract_strided_slice %139 {offsets = [0, 64], sizes = [2, 64], strides = [1, 1]} : vector<2x256xf32> to vector<2x64xf32>
    %143 = vector.extract_strided_slice %140 {offsets = [0, 128], sizes = [2, 64], strides = [1, 1]} : vector<2x256xf32> to vector<2x64xf32>
    %144 = vector.extract_strided_slice %139 {offsets = [0, 192], sizes = [2, 64], strides = [1, 1]} : vector<2x256xf32> to vector<2x64xf32>
    %145 = arith.mulf %142, %125 : vector<2x64xf32>
    %146 = arith.mulf %141, %143 : vector<2x64xf32>
    %147 = arith.addf %145, %146 : vector<2x64xf32>
    %148 = math.tanh %147 : vector<2x64xf32>
    %149 = arith.mulf %144, %148 : vector<2x64xf32>
    %cst_29 = arith.constant dense<0.000000e+00> : vector<2x256xf32>
    %150 = tpu.matmul %149, %8, %cst_29 {dimension_numbers = #tpu.dot_dimension_numbers<[1], [0], [0], [1], [0, 0, 1, 1], [], []>} : vector<2x64xf32>, vector<64x256xf32>, vector<2x256xf32> -> vector<2x256xf32>
    %151 = vector.extract_strided_slice %7 {offsets = [12, 0], sizes = [2, 256], strides = [1, 1]} : vector<16x256xf32> to vector<2x256xf32>
    %152 = arith.addf %150, %151 : vector<2x256xf32>
    %cst_30 = arith.constant 5.000000e-01 : f32
    %153 = vector.broadcast %cst_30 : f32 to vector<2x256xf32>
    %154 = arith.mulf %153, %152 : vector<2x256xf32>
    %155 = tpu.concatenate %154, %152 in 0 : vector<2x256xf32>, vector<2x256xf32> -> vector<4x256xf32>
    %156 = math.tanh %155 : vector<4x256xf32>
    %157 = vector.extract_strided_slice %156 {offsets = [0, 0], sizes = [2, 256], strides = [1, 1]} : vector<4x256xf32> to vector<2x256xf32>
    %cst_31 = arith.constant 1.000000e+00 : f32
    %158 = vector.broadcast %cst_31 : f32 to vector<2x256xf32>
    %159 = arith.addf %157, %158 : vector<2x256xf32>
    %cst_32 = arith.constant 5.000000e-01 : f32
    %160 = vector.broadcast %cst_32 : f32 to vector<2x256xf32>
    %161 = arith.mulf %160, %159 : vector<2x256xf32>
    %162 = vector.extract_strided_slice %156 {offsets = [2, 0], sizes = [2, 256], strides = [1, 1]} : vector<4x256xf32> to vector<2x256xf32>
    %163 = vector.extract_strided_slice %161 {offsets = [0, 0], sizes = [2, 64], strides = [1, 1]} : vector<2x256xf32> to vector<2x64xf32>
    %164 = vector.extract_strided_slice %161 {offsets = [0, 64], sizes = [2, 64], strides = [1, 1]} : vector<2x256xf32> to vector<2x64xf32>
    %165 = vector.extract_strided_slice %162 {offsets = [0, 128], sizes = [2, 64], strides = [1, 1]} : vector<2x256xf32> to vector<2x64xf32>
    %166 = vector.extract_strided_slice %161 {offsets = [0, 192], sizes = [2, 64], strides = [1, 1]} : vector<2x256xf32> to vector<2x64xf32>
    %167 = arith.mulf %164, %147 : vector<2x64xf32>
    %168 = arith.mulf %163, %165 : vector<2x64xf32>
    %169 = arith.addf %167, %168 : vector<2x64xf32>
    %170 = math.tanh %169 : vector<2x64xf32>
    %171 = arith.mulf %166, %170 : vector<2x64xf32>
    %cst_33 = arith.constant dense<0.000000e+00> : vector<2x256xf32>
    %172 = tpu.matmul %171, %8, %cst_33 {dimension_numbers = #tpu.dot_dimension_numbers<[1], [0], [0], [1], [0, 0, 1, 1], [], []>} : vector<2x64xf32>, vector<64x256xf32>, vector<2x256xf32> -> vector<2x256xf32>
    %173 = vector.extract_strided_slice %7 {offsets = [14, 0], sizes = [2, 256], strides = [1, 1]} : vector<16x256xf32> to vector<2x256xf32>
    %174 = arith.addf %172, %173 : vector<2x256xf32>
    %cst_34 = arith.constant 5.000000e-01 : f32
    %175 = vector.broadcast %cst_34 : f32 to vector<2x256xf32>
    %176 = arith.mulf %175, %174 : vector<2x256xf32>
    %177 = tpu.concatenate %176, %174 in 0 : vector<2x256xf32>, vector<2x256xf32> -> vector<4x256xf32>
    %178 = math.tanh %177 : vector<4x256xf32>
    %179 = vector.extract_strided_slice %178 {offsets = [0, 0], sizes = [2, 256], strides = [1, 1]} : vector<4x256xf32> to vector<2x256xf32>
    %cst_35 = arith.constant 1.000000e+00 : f32
    %180 = vector.broadcast %cst_35 : f32 to vector<2x256xf32>
    %181 = arith.addf %179, %180 : vector<2x256xf32>
    %cst_36 = arith.constant 5.000000e-01 : f32
    %182 = vector.broadcast %cst_36 : f32 to vector<2x256xf32>
    %183 = arith.mulf %182, %181 : vector<2x256xf32>
    %184 = vector.extract_strided_slice %178 {offsets = [2, 0], sizes = [2, 256], strides = [1, 1]} : vector<4x256xf32> to vector<2x256xf32>
    %185 = vector.extract_strided_slice %183 {offsets = [0, 0], sizes = [2, 64], strides = [1, 1]} : vector<2x256xf32> to vector<2x64xf32>
    %186 = vector.extract_strided_slice %183 {offsets = [0, 64], sizes = [2, 64], strides = [1, 1]} : vector<2x256xf32> to vector<2x64xf32>
    %187 = vector.extract_strided_slice %184 {offsets = [0, 128], sizes = [2, 64], strides = [1, 1]} : vector<2x256xf32> to vector<2x64xf32>
    %188 = vector.extract_strided_slice %183 {offsets = [0, 192], sizes = [2, 64], strides = [1, 1]} : vector<2x256xf32> to vector<2x64xf32>
    %189 = arith.mulf %186, %169 : vector<2x64xf32>
    %190 = arith.mulf %185, %187 : vector<2x64xf32>
    %191 = arith.addf %189, %190 : vector<2x64xf32>
    %192 = math.tanh %191 : vector<2x64xf32>
    %193 = arith.mulf %188, %192 : vector<2x64xf32>
    %cst_37 = arith.constant dense<0.000000e+00> : vector<2x256xf32>
    %194 = tpu.matmul %193, %8, %cst_37 {dimension_numbers = #tpu.dot_dimension_numbers<[1], [0], [0], [1], [0, 0, 1, 1], [], []>} : vector<2x64xf32>, vector<64x256xf32>, vector<2x256xf32> -> vector<2x256xf32>
    %195 = vector.broadcast %9 : vector<1x256xf32> to vector<2x256xf32>
    %196 = arith.addf %194, %195 : vector<2x256xf32>
    %cst_38 = arith.constant 5.000000e-01 : f32
    %197 = vector.broadcast %cst_38 : f32 to vector<2x256xf32>
    %198 = arith.mulf %197, %196 : vector<2x256xf32>
    %199 = tpu.concatenate %198, %196 in 0 : vector<2x256xf32>, vector<2x256xf32> -> vector<4x256xf32>
    %200 = math.tanh %199 : vector<4x256xf32>
    %201 = vector.extract_strided_slice %200 {offsets = [0, 0], sizes = [2, 256], strides = [1, 1]} : vector<4x256xf32> to vector<2x256xf32>
    %cst_39 = arith.constant 1.000000e+00 : f32
    %202 = vector.broadcast %cst_39 : f32 to vector<2x256xf32>
    %203 = arith.addf %201, %202 : vector<2x256xf32>
    %cst_40 = arith.constant 5.000000e-01 : f32
    %204 = vector.broadcast %cst_40 : f32 to vector<2x256xf32>
    %205 = arith.mulf %204, %203 : vector<2x256xf32>
    %206 = vector.extract_strided_slice %200 {offsets = [2, 0], sizes = [2, 256], strides = [1, 1]} : vector<4x256xf32> to vector<2x256xf32>
    %207 = vector.extract_strided_slice %205 {offsets = [0, 0], sizes = [2, 64], strides = [1, 1]} : vector<2x256xf32> to vector<2x64xf32>
    %208 = vector.extract_strided_slice %205 {offsets = [0, 64], sizes = [2, 64], strides = [1, 1]} : vector<2x256xf32> to vector<2x64xf32>
    %209 = vector.extract_strided_slice %206 {offsets = [0, 128], sizes = [2, 64], strides = [1, 1]} : vector<2x256xf32> to vector<2x64xf32>
    %210 = vector.extract_strided_slice %205 {offsets = [0, 192], sizes = [2, 64], strides = [1, 1]} : vector<2x256xf32> to vector<2x64xf32>
    %211 = arith.mulf %208, %191 : vector<2x64xf32>
    %212 = arith.mulf %207, %209 : vector<2x64xf32>
    %213 = arith.addf %211, %212 : vector<2x64xf32>
    %214 = math.tanh %213 : vector<2x64xf32>
    %215 = arith.mulf %210, %214 : vector<2x64xf32>
    %216 = vector.extract_strided_slice %215 {offsets = [0, 32], sizes = [2, 32], strides = [1, 1]} : vector<2x64xf32> to vector<2x32xf32>
    %c0_41 = arith.constant 0 : index
    %c0_42 = arith.constant 0 : index
    %217 = vector.load %arg2[%c0_41, %c0_42] : memref<40x4xf32, #tpu.memory_space<vmem>>, vector<32x4xf32>
    %cst_43 = arith.constant dense<0.000000e+00> : vector<2x4xf32>
    %218 = tpu.matmul %216, %217, %cst_43 {dimension_numbers = #tpu.dot_dimension_numbers<[1], [0], [0], [1], [0, 0, 1, 1], [], []>} : vector<2x32xf32>, vector<32x4xf32>, vector<2x4xf32> -> vector<2x4xf32>
    %c32 = arith.constant 32 : index
    %c0_44 = arith.constant 0 : index
    %219 = vector.load %arg2[%c32, %c0_44] : memref<40x4xf32, #tpu.memory_space<vmem>>, vector<1x4xf32>
    %220 = vector.broadcast %219 : vector<1x4xf32> to vector<2x4xf32>
    %221 = arith.addf %218, %220 : vector<2x4xf32>
    %c0_45 = arith.constant 0 : index
    %c0_46 = arith.constant 0 : index
    %222 = vector.load %arg3[%c0_45, %c0_46] : memref<2x4xf32, #tpu.memory_space<vmem>>, vector<2x4xf32>
    %cst_47 = arith.constant 2.000000e-01 : f32
    %223 = vector.broadcast %cst_47 : f32 to vector<2x4xf32>
    %224 = arith.cmpf olt, %222, %223 : vector<2x4xf32>
    %cst_48 = arith.constant 5.000000e+00 : f32
    %225 = vector.broadcast %cst_48 : f32 to vector<2x4xf32>
    %226 = arith.mulf %221, %225 : vector<2x4xf32>
    %cst_49 = arith.constant 0.000000e+00 : f32
    %227 = vector.broadcast %cst_49 : f32 to vector<2x4xf32>
    %228 = arith.select %224, %226, %227 : vector<2x4xi1>, vector<2x4xf32>
    %cst_50 = arith.constant dense<0xFF800000> : vector<2xf32>
    %229 = vector.multi_reduction <maximumf>, %228, %cst_50 [1] : vector<2x4xf32> to vector<2xf32>
    %230 = vector.shape_cast %229 : vector<2xf32> to vector<2x1xf32>
    %231 = vector.broadcast %230 : vector<2x1xf32> to vector<2x4xf32>
    %232 = arith.subf %228, %231 : vector<2x4xf32>
    %233 = math.exp %232 : vector<2x4xf32>
    %cst_51 = arith.constant dense<0.000000e+00> : vector<2xf32>
    %234 = vector.multi_reduction <add>, %233, %cst_51 [1] : vector<2x4xf32> to vector<2xf32>
    %235 = vector.shape_cast %234 : vector<2xf32> to vector<2x1xf32>
    %236 = math.log %235 : vector<2x1xf32>
    %237 = arith.addf %230, %236 : vector<2x1xf32>
    %238 = vector.broadcast %237 : vector<2x1xf32> to vector<2x4xf32>
    %239 = arith.subf %228, %238 : vector<2x4xf32>
    %c0_52 = arith.constant 0 : index
    %c0_53 = arith.constant 0 : index
    %240 = vector.load %arg4[%c0_52, %c0_53] : memref<2x4xf32, #tpu.memory_space<vmem>>, vector<2x4xf32>
    tpu.vector_store %arg4[%c0_52, %c0_53], %239 {strides = array<i32>} : memref<2x4xf32, #tpu.memory_space<vmem>>, vector<2x4xf32>,
    return
  }
}

</mosaic_0001>

<bundles_post_ra>
// kernel: tpu_custom_call.1
= control target key start
LH: loop header
LB: loop body
LE: loop exit
PB: predicated region body
PF: predicated region fallthrough
CT: control target
= control target key end

     0   :  { %9 = vsyncpa [#allocation3], 0  ;;  %s1338_s0 = inlined_call_operand.vmem [shape: s32[16,1], index: 0, kind: input, shape index: {}]   ;;  %s1339_s1 = inlined_call_operand.hbm [shape: f32[200,256], index: 1, kind: input, shape index: {}]   ;;  %s1340_s2 = inlined_call_operand.vmem [shape: f32[40,4], index: 2, kind: input, shape index: {}]   ;;  %s1341_s3 = inlined_call_operand.vmem [shape: f32[2,4], index: 3, kind: input, shape index: {}]   ;;  %s1342_s4 = inlined_call_operand.hbm [shape: f32[2,4], index: 4, kind: output, shape index: {}]  }
   0x1   :  { %10 = vsyncpa [#allocation4], 0  ;;  %s17_s17 = sshll.u32 %s1339_s1, 4  ;;  %s1010_s18 = smov [#allocation2]   ;;  %s18_s17 = int_to_ptr.hbm [resolvable:$true] %s17_s17 }
   0x2   :  { %s19_s19 = sshll.u32 %s1010_s18, 4  ;;  %s1011_s20 = smov 256   ;;  %s20_s19 = int_to_ptr.vmem [resolvable:$true] %s19_s19 }
   0x3   :  { %s1012_s21 = smov 16  }
   0x4   :  { %25 = dma.hbm_to_vmem [thread:$0]  %s18_s17, 6400, %s20_s19, [#allocation3], %s1011_s20, %s1011_s20, %s1012_s21  }
   0x5   :  { %1006 = dma.done.wait [#allocation3], 6400  }
   0x6   :  { %1007 = vsyncadd [#allocation3], 4294960896  ;;  %v1013_v0 = vmov 0   ;;  %v34_v1 = vld [vmem:[%s1338_s0] sm:$0xff]  ;;  %v80_v2 = vld [vmem:[#allocation2 + $0xf0] sm:$0xff]  ;;  %v36_v34 = vlaneseq  ;;  %v1014_v37 = vmov 1.0  }
   0x7   :  { %897 = vset.pattern.permute.xlu0 %v1013_v0  ;;  %898 = vset.pattern.permute.xlu1 %v1013_v0  ;;  %v81_v3 = vld [vmem:[#allocation2 + $0xf8] sm:$0xff]  ;;  %v78_v4 = vld [vmem:[#allocation2 + $0xe0] sm:$0xff]  ;;  %v79_v5 = vld [vmem:[#allocation2 + $0xe8] sm:$0xff]  ;;  %v1015_v38 = vmov 0.0   ;;  %s1016_s1 = smov 64   ;;  %vm157_vm2 = vcmask 1041408  }
   0x8   :  { %39 = vperm.xlu0 %897, %v34_v1   ;;  %82 = vmatpush.msra.mxu0 %v80_v2  ;;  %v76_v6 = vld [vmem:[#allocation2 + $0xd0] sm:$0xff]  ;;  %v77_v7 = vld [vmem:[#allocation2 + $0xd8] sm:$0xff]  ;;  %v74_v8 = vld [vmem:[#allocation2 + $0xc0] sm:$0xff]  ;;  %v1050_v35 = vand.u32 127, %v36_v34  ;;  %vm191_vm3 = vcmask 523264   ;;  %s1017_s7 = smov 32  }
   0x9   :  { %105 = vmatpush.msra.mxu1 %v81_v3  ;;  %v75_v9 = vld [vmem:[#allocation2 + $0xc8] sm:$0xff]  ;;  %v72_v10 = vld [vmem:[#allocation2 + $0xb0] sm:$0xff]  ;;  %v73_v11 = vld [vmem:[#allocation2 + $0xb8] sm:$0xff]  ;;  %vm805_vm5 = vcmask 261120   ;;  %vm832_vm7 = vcmask 25600   ;;  %s854_s14 = sshll.u32 %s1342_s4, 4  ;;  %s855_s14 = int_to_ptr.hbm [resolvable:$true] %s854_s14 }
   0xa   :  { %83 = vmatpush.msra.mxu0 %v78_v4  ;;  %v70_v12 = vld [vmem:[#allocation2 + $0xa0] sm:$0xff]  ;;  %v71_v13 = vld [vmem:[#allocation2 + $0xa8] sm:$0xff]  ;;  %v68_v14 = vld [vmem:[#allocation2 + $0x90] sm:$0xff]  ;;  %vm146_vm1 = vcmp.lt.s32.totalorder %v1050_v35, 32 }
   0xb   :  { %106 = vmatpush.msra.mxu1 %v79_v5  ;;  %v69_v15 = vld [vmem:[#allocation2 + $0x98] sm:$0xff]  ;;  %v66_v16 = vld [vmem:[#allocation2 + $0x80] sm:$0xff]  ;;  %v67_v17 = vld [vmem:[#allocation2 + $0x88] sm:$0xff]  ;;  %v870_v39 = vsel %vm146_vm1, 1.0, %v1015_v38 }
   0xc   :  { %84 = vmatpush.msra.mxu0 %v76_v6  ;;  %v64_v18 = vld [vmem:[#allocation2 + $0x70] sm:$0xff]  ;;  %v65_v19 = vld [vmem:[#allocation2 + $0x78] sm:$0xff]  ;;  %v62_v20 = vld [vmem:[#allocation2 + $0x60] sm:$0xff]  ;;  %179 = vrot.lane.b32.xlu1 %v870_v39, %s1016_s1 }
   0xd   :  { %107 = vmatpush.msra.mxu1 %v77_v7  ;;  %v63_v21 = vld [vmem:[#allocation2 + $0x68] sm:$0xff]  ;;  %v60_v22 = vld [vmem:[#allocation2 + $0x50] sm:$0xff]  ;;  %v61_v23 = vld [vmem:[#allocation2 + $0x58] sm:$0xff] }
   0xe   :  { %85 = vmatpush.msra.mxu0 %v74_v8  ;;  %v58_v24 = vld [vmem:[#allocation2 + $0x40] sm:$0xff]  ;;  %v59_v25 = vld [vmem:[#allocation2 + $0x48] sm:$0xff]  ;;  %v56_v26 = vld [vmem:[#allocation2 + $0x30] sm:$0xff] }
   0xf   :  { %108 = vmatpush.msra.mxu1 %v75_v9  ;;  %v57_v27 = vld [vmem:[#allocation2 + $0x38] sm:$0xff]  ;;  %v54_v28 = vld [vmem:[#allocation2 + $0x20] sm:$0xff]  ;;  %v55_v29 = vld [vmem:[#allocation2 + $0x28] sm:$0xff] }
  0x10   :  { %86 = vmatpush.msra.mxu0 %v72_v10  ;;  %v52_v30 = vld [vmem:[#allocation2 + $0x10] sm:$0xff]  ;;  %v53_v31 = vld [vmem:[#allocation2 + $0x18] sm:$0xff]  ;;  %v50_v32 = vld [vmem:[#allocation2] sm:$0xff] }
  0x11   :  { %109 = vmatpush.msra.mxu1 %v73_v11  ;;  %v51_v33 = vld [vmem:[#allocation2 + $0x8] sm:$0xff]  ;;  %v1075_v54 = vld [vmem:[#allocation2 + $0x170] sm:$0xff]  ;;  %v1077_v55 = vld [vmem:[#allocation2 + $0x178] sm:$0xff] }
  0x12   :  { %87 = vmatpush.msra.mxu0 %v70_v12  ;;  %v1079_v56 = vld [vmem:[#allocation2 + $0x160] sm:$0xff]  ;;  %202 = vmatpush.msra.mxu2 %v1075_v54  ;;  %v1083_v57 = vld [vmem:[#allocation2 + $0x168] sm:$0xff]  ;;  %v1085_v58 = vld [vmem:[#allocation2 + $0x150] sm:$0xff] }
  0x13   :  { %110 = vmatpush.msra.mxu1 %v71_v13  ;;  %222 = vmatpush.msra.mxu3 %v1077_v55  ;;  %v1087_v59 = vld [vmem:[#allocation2 + $0x158] sm:$0xff]  ;;  %v1093_v60 = vld [vmem:[#allocation2 + $0x140] sm:$0xff]  ;;  %v1095_v61 = vld [vmem:[#allocation2 + $0x148] sm:$0xff] }
  0x14   :  { %88 = vmatpush.msra.mxu0 %v68_v14  ;;  %203 = vmatpush.msra.mxu2 %v1079_v56  ;;  %v1101_v62 = vld [vmem:[#allocation2 + $0x130] sm:$0xff]  ;;  %v1103_v63 = vld [vmem:[#allocation2 + $0x138] sm:$0xff]  ;;  %v1109_v0 = vld [vmem:[#allocation2 + $0x120] sm:$0xff] }
  0x15   :  { %111 = vmatpush.msra.mxu1 %v69_v15  ;;  %223 = vmatpush.msra.mxu3 %v1083_v57  ;;  %v1111_v1 = vld [vmem:[#allocation2 + $0x128] sm:$0xff]  ;;  %v1117_v2 = vld [vmem:[#allocation2 + $0x110] sm:$0xff]  ;;  %v1119_v3 = vld [vmem:[#allocation2 + $0x118] sm:$0xff] }
  0x16   :  { %89 = vmatpush.msra.mxu0 %v66_v16  ;;  %204 = vmatpush.msra.mxu2 %v1085_v58  ;;  %v1125_v4 = vld [vmem:[#allocation2 + $0x100] sm:$0xff]  ;;  %v1127_v5 = vld [vmem:[#allocation2 + $0x108] sm:$0xff] }
  0x17   :  { %112 = vmatpush.msra.mxu1 %v67_v17  ;;  %224 = vmatpush.msra.mxu3 %v1087_v59 }
  0x18   :  { %90 = vmatpush.msra.mxu0 %v64_v18  ;;  %205 = vmatpush.msra.mxu2 %v1093_v60 }
  0x19   :  { %113 = vmatpush.msra.mxu1 %v65_v19  ;;  %225 = vmatpush.msra.mxu3 %v1095_v61 }
  0x1a   :  { %91 = vmatpush.msra.mxu0 %v62_v20  ;;  %206 = vmatpush.msra.mxu2 %v1101_v62 }
  0x1b   :  { %114 = vmatpush.msra.mxu1 %v63_v21  ;;  %226 = vmatpush.msra.mxu3 %v1103_v63 }
  0x1c   :  { %92 = vmatpush.msra.mxu0 %v60_v22  ;;  %207 = vmatpush.msra.mxu2 %v1109_v0 }
  0x1d   :  { %115 = vmatpush.msra.mxu1 %v61_v23  ;;  %227 = vmatpush.msra.mxu3 %v1111_v1 }
  0x1e   :  { %93 = vmatpush.msra.mxu0 %v58_v24  ;;  %208 = vmatpush.msra.mxu2 %v1117_v2 }
  0x1f   :  { %116 = vmatpush.msra.mxu1 %v59_v25  ;;  %228 = vmatpush.msra.mxu3 %v1119_v3 }
  0x20   :  { %94 = vmatpush.msra.mxu0 %v56_v26  ;;  %209 = vmatpush.msra.mxu2 %v1125_v4 }
  0x21   :  { %117 = vmatpush.msra.mxu1 %v57_v27  ;;  %229 = vmatpush.msra.mxu3 %v1127_v5 }
  0x22   :  { %95 = vmatpush.msra.mxu0 %v54_v28  ;;  %279 = vmatpush.msrb.mxu2 %v1075_v54 }
  0x23   :  { %118 = vmatpush.msra.mxu1 %v55_v29  ;;  %299 = vmatpush.msrb.mxu3 %v1077_v55 }
  0x24   :  { %96 = vmatpush.msra.mxu0 %v52_v30  ;;  %280 = vmatpush.msrb.mxu2 %v1079_v56 }
  0x25   :  { %119 = vmatpush.msra.mxu1 %v53_v31  ;;  %300 = vmatpush.msrb.mxu3 %v1083_v57 }
  0x26   :  { %97 = vmatpush.msra.mxu0 %v50_v32  ;;  %281 = vmatpush.msrb.mxu2 %v1085_v58 }
  0x27   :  { %120 = vmatpush.msra.mxu1 %v51_v33  ;;  %301 = vmatpush.msrb.mxu3 %v1087_v59 }
  0x28   :  { %352 = vmatpush.msrb.mxu0 %v1075_v54  ;;  %282 = vmatpush.msrb.mxu2 %v1093_v60 }
  0x29   :  { %372 = vmatpush.msrb.mxu1 %v1077_v55  ;;  %302 = vmatpush.msrb.mxu3 %v1095_v61 }
  0x2a   :  { %353 = vmatpush.msrb.mxu0 %v1079_v56  ;;  %283 = vmatpush.msrb.mxu2 %v1101_v62 }
  0x2b   :  { %373 = vmatpush.msrb.mxu1 %v1083_v57  ;;  %303 = vmatpush.msrb.mxu3 %v1103_v63 }
  0x2c   :  { %354 = vmatpush.msrb.mxu0 %v1085_v58  ;;  %284 = vmatpush.msrb.mxu2 %v1109_v0 }
  0x2d   :  { %374 = vmatpush.msrb.mxu1 %v1087_v59  ;;  %304 = vmatpush.msrb.mxu3 %v1111_v1 }
  0x2e   :  { %355 = vmatpush.msrb.mxu0 %v1093_v60  ;;  %285 = vmatpush.msrb.mxu2 %v1117_v2 }
  0x2f   :  { %375 = vmatpush.msrb.mxu1 %v1095_v61  ;;  %305 = vmatpush.msrb.mxu3 %v1119_v3 }
  0x30   :  { %356 = vmatpush.msrb.mxu0 %v1101_v62  ;;  %286 = vmatpush.msrb.mxu2 %v1125_v4 }
  0x31   :  { %376 = vmatpush.msrb.mxu1 %v1103_v63  ;;  %306 = vmatpush.msrb.mxu3 %v1127_v5 }
  0x32   :  { %357 = vmatpush.msrb.mxu0 %v1109_v0 }
  0x33   :  { %377 = vmatpush.msrb.mxu1 %v1111_v1 }
  0x34   :  { %358 = vmatpush.msrb.mxu0 %v1117_v2 }
  0x35   :  { %378 = vmatpush.msrb.mxu1 %v1119_v3 }
  0x36   :  { %359 = vmatpush.msrb.mxu0 %v1125_v4 }
  0x37   :  { %379 = vmatpush.msrb.mxu1 %v1127_v5 }
  0x7a   :  { %v40_v36 = vpop.permute.xlu0 %39 }
  0x7b   :  { %vm44_vm0 = vcmp.eq.s32.totalorder %v1050_v35, %v40_v36 }
  0x7c   :  { %866 = vmatmul.msk.f32.vlgmr.msra.gmra.mxu0 %vm44_vm0, %v1014_v37  ;;  %868 = vmatmul.msk.f32.vlgmr.msra.gmra.mxu1 %vm44_vm0, %v1014_v37 }
  0x7d   :  { %504 = vmatpush.msra.mxu0 %v1075_v54  ;;  %524 = vmatpush.msra.mxu1 %v1077_v55 }
  0x7e   :  { %v180_v13 = vpop.permute.xlu1 %179 }
  0x7f   :  { %505 = vmatpush.msra.mxu0 %v1079_v56  ;;  %525 = vmatpush.msra.mxu1 %v1083_v57 }
  0x81   :  { %506 = vmatpush.msra.mxu0 %v1085_v58  ;;  %526 = vmatpush.msra.mxu1 %v1087_v59 }
  0x83   :  { %507 = vmatpush.msra.mxu0 %v1093_v60  ;;  %527 = vmatpush.msra.mxu1 %v1095_v61 }
  0x85   :  { %508 = vmatpush.msra.mxu0 %v1101_v62  ;;  %528 = vmatpush.msra.mxu1 %v1103_v63 }
  0x87   :  { %509 = vmatpush.msra.mxu0 %v1109_v0  ;;  %529 = vmatpush.msra.mxu1 %v1111_v1 }
  0x89   :  { %510 = vmatpush.msra.mxu0 %v1117_v2  ;;  %530 = vmatpush.msra.mxu1 %v1119_v3 }
  0x8b   :  { %511 = vmatpush.msra.mxu0 %v1125_v4  ;;  %531 = vmatpush.msra.mxu1 %v1127_v5 }
  0xf9   :  { %v1057_v40 = vpop.f32.mrf.mxu0  ;;  %v1059_v41 = vpop.f32.mrf.mxu1 }
  0xfa   :  { %v149_v42 = vmul.f32 0.5, %v1057_v40  ;;  %v153_v43 = vrot.slane %v1057_v40, 6  ;;  %v150_v44 = vmul.f32 0.5, %v1059_v41  ;;  %v154_v45 = vrot.slane %v1059_v41, 6 }
  0xfb   :  { %v187_v16 = vrot.slane %v1057_v40, 2  ;;  %v188_v17 = vrot.slane %v1059_v41, 2 }
  0xfc   :  { %v159_v46 = vsel %vm157_vm2, %v150_v44, %v154_v45  ;;  %v158_v47 = vsel %vm157_vm2, %v149_v42, %v153_v43 }
  0xfd   :  { %900 = vtanh.f32 %v159_v46 }
  0xfe   :  { %902 = vtanh.f32 %v158_v47 }
 0x103   :  { %v1071_v48 = vpop.eup %900 }
 0x104   :  { %v903_v49 = vpop.eup %902  ;;  %v168_v52 = vrot.slane %v1071_v48, 2  ;;  %v163_v9 = vadd.f32 1.0, %v1071_v48 }
 0x105   :  { %v162_v50 = vadd.f32 1.0, %v903_v49  ;;  %v35_v49 = vld [vmem:[%s1338_s0 + $0x8] sm:$0xff] }
 0x106   :  { %v165_v10 = vmul.f32 0.5, %v163_v9 }
 0x107   :  { %v164_v51 = vmul.f32 0.5, %v162_v50  ;;  %v265_v50 = vrot.slane %v1057_v40, 4 }
 0x109   :  { %v170_v53 = vmul.f32 %v168_v52, %v164_v51  ;;  %v166_v6 = vmul.f32 0.0, %v164_v51  ;;  %v266_v51 = vrot.slane %v1059_v41, 4 }
 0x10b   :  { %172 = vrot.lane.b32.xlu0 %v170_v53, %s1016_s1 }
 0x17d   :  { %v173_v7 = vpop.permute.xlu0 %172 }
 0x17e   :  { %v1143_v8 = vadd.f32 %v173_v7, %v166_v6 }
 0x180   :  { %904 = vtanh.f32 %v1143_v8  ;;  %v183_v31 = vmul.f32 %v180_v13, %v1143_v8 }
 0x186   :  { %v905_v11 = vpop.eup %904 }
 0x187   :  { %v177_v12 = vmul.f32 %v905_v11, %v165_v10 }
 0x189   :  { %v182_v14 = vmul.f32 %v180_v13, %v177_v12 }
 0x18b   :  { %185 = vrot.lane.b32.xlu1 %v182_v14, %s1016_s1 }
 0x193   :  { %42 = vperm.xlu1 %898, %v35_v49  }
 0x1fd   :  { %v186_v15 = vpop.permute.xlu1 %185 }
 0x1fe   :  { %871 = vmatmul.msk.f32.vlgmr.msra.gmra.mxu2 %vm191_vm3, %v186_v15  ;;  %872 = vmatmul.msk.f32.vlgmr.msra.gmra.mxu3 %vm191_vm3, %v186_v15 }
 0x1ff   :  { %425 = vmatpush.msra.mxu2 %v1075_v54  ;;  %445 = vmatpush.msra.mxu3 %v1077_v55 }
 0x201   :  { %426 = vmatpush.msra.mxu2 %v1079_v56  ;;  %446 = vmatpush.msra.mxu3 %v1083_v57 }
 0x203   :  { %427 = vmatpush.msra.mxu2 %v1085_v58  ;;  %447 = vmatpush.msra.mxu3 %v1087_v59 }
 0x205   :  { %428 = vmatpush.msra.mxu2 %v1093_v60  ;;  %448 = vmatpush.msra.mxu3 %v1095_v61 }
 0x207   :  { %429 = vmatpush.msra.mxu2 %v1101_v62  ;;  %449 = vmatpush.msra.mxu3 %v1103_v63 }
 0x209   :  { %430 = vmatpush.msra.mxu2 %v1109_v0  ;;  %450 = vmatpush.msra.mxu3 %v1111_v1 }
 0x20b   :  { %431 = vmatpush.msra.mxu2 %v1117_v2  ;;  %451 = vmatpush.msra.mxu3 %v1119_v3 }
 0x20d   :  { %432 = vmatpush.msra.mxu2 %v1125_v4  ;;  %452 = vmatpush.msra.mxu3 %v1127_v5 }
 0x281   :  { %v211_v18 = vpop.f32.mrf.mxu2  ;;  %v231_v19 = vpop.f32.mrf.mxu3 }
 0x282   :  { %v212_v20 = vadd.f32 %v211_v18, %v187_v16  ;;  %v232_v21 = vadd.f32 %v231_v19, %v188_v17 }
 0x284   :  { %v234_v22 = vmul.f32 0.5, %v212_v20  ;;  %v238_v23 = vrot.slane %v212_v20, 6  ;;  %v235_v24 = vmul.f32 0.5, %v232_v21  ;;  %v239_v25 = vrot.slane %v232_v21, 6  ;;  %v43_v20 = vpop.permute.xlu1 %42 }
 0x285   :  { %vm45_vm4 = vcmp.eq.s32.totalorder %v1050_v35, %v43_v20 }
 0x286   :  { %v243_v26 = vsel %vm157_vm2, %v235_v24, %v239_v25  ;;  %v242_v27 = vsel %vm157_vm2, %v234_v22, %v238_v23  ;;  %867 = vmatmul.msk.f32.gmra.mxu0 %vm45_vm4, %v1014_v37  ;;  %869 = vmatmul.msk.f32.gmra.mxu1 %vm45_vm4, %v1014_v37 }
 0x287   :  { %906 = vtanh.f32 %v243_v26 }
 0x288   :  { %908 = vtanh.f32 %v242_v27 }
 0x28d   :  { %v907_v28 = vpop.eup %906 }
 0x28e   :  { %v909_v29 = vpop.eup %908  ;;  %v252_v33 = vrot.slane %v907_v28, 2  ;;  %v247_v42 = vadd.f32 1.0, %v907_v28 }
 0x28f   :  { %v246_v30 = vadd.f32 1.0, %v909_v29 }
 0x290   :  { %v249_v44 = vmul.f32 0.5, %v247_v42 }
 0x291   :  { %v248_v32 = vmul.f32 0.5, %v246_v30 }
 0x293   :  { %v254_v34 = vmul.f32 %v252_v33, %v248_v32  ;;  %v250_v36 = vmul.f32 %v248_v32, %v183_v31 }
 0x295   :  { %256 = vrot.lane.b32.xlu2 %v254_v34, %s1016_s1 }
 0x2ef   :  { %v257_v38 = vpop.permute.xlu2 %256 }
 0x2f0   :  { %v259_v39 = vadd.f32 %v257_v38, %v250_v36 }
 0x2f2   :  { %910 = vtanh.f32 %v259_v39 }
 0x2f8   :  { %v911_v46 = vpop.eup %910 }
 0x2f9   :  { %v261_v47 = vmul.f32 %v911_v46, %v249_v44 }
 0x2fb   :  { %263 = vrot.lane.b32.xlu2 %v261_v47, %s1016_s1 }
 0x303   :  { %v1249_v35 = vpop.f32.mrf.mxu0  ;;  %v1251_v37 = vpop.f32.mrf.mxu1 }
 0x355   :  { %v264_v48 = vpop.permute.xlu2 %263 }
 0x356   :  { %873 = vmatmul.msk.f32.vlgmr.msrb.gmra.mxu2 %vm191_vm3, %v264_v48  ;;  %874 = vmatmul.msk.f32.vlgmr.msrb.gmra.mxu3 %vm191_vm3, %v264_v48 }
 0x357   :  { %581 = vmatpush.msrb.mxu2 %v1075_v54  ;;  %601 = vmatpush.msrb.mxu3 %v1077_v55 }
 0x359   :  { %582 = vmatpush.msrb.mxu2 %v1079_v56  ;;  %602 = vmatpush.msrb.mxu3 %v1083_v57 }
 0x35b   :  { %583 = vmatpush.msrb.mxu2 %v1085_v58  ;;  %603 = vmatpush.msrb.mxu3 %v1087_v59 }
 0x35d   :  { %584 = vmatpush.msrb.mxu2 %v1093_v60  ;;  %604 = vmatpush.msrb.mxu3 %v1095_v61 }
 0x35f   :  { %585 = vmatpush.msrb.mxu2 %v1101_v62  ;;  %605 = vmatpush.msrb.mxu3 %v1103_v63 }
 0x361   :  { %586 = vmatpush.msrb.mxu2 %v1109_v0  ;;  %606 = vmatpush.msrb.mxu3 %v1111_v1 }
 0x363   :  { %587 = vmatpush.msrb.mxu2 %v1117_v2  ;;  %607 = vmatpush.msrb.mxu3 %v1119_v3 }
 0x365   :  { %588 = vmatpush.msrb.mxu2 %v1125_v4  ;;  %608 = vmatpush.msrb.mxu3 %v1127_v5 }
 0x3d9   :  { %v288_v52 = vpop.f32.mrf.mxu2  ;;  %v308_v53 = vpop.f32.mrf.mxu3 }
 0x3da   :  { %v289_v6 = vadd.f32 %v288_v52, %v265_v50  ;;  %v309_v7 = vadd.f32 %v308_v53, %v266_v51 }
 0x3dc   :  { %v311_v8 = vmul.f32 0.5, %v289_v6  ;;  %v315_v9 = vrot.slane %v289_v6, 6  ;;  %v312_v10 = vmul.f32 0.5, %v309_v7  ;;  %v316_v11 = vrot.slane %v309_v7, 6 }
 0x3de   :  { %v319_v12 = vsel %vm157_vm2, %v311_v8, %v315_v9  ;;  %v320_v13 = vsel %vm157_vm2, %v312_v10, %v316_v11 }
 0x3df   :  { %912 = vtanh.f32 %v319_v12 }
 0x3e0   :  { %914 = vtanh.f32 %v320_v13 }
 0x3e5   :  { %v913_v14 = vpop.eup %912 }
 0x3e6   :  { %v915_v15 = vpop.eup %914  ;;  %v323_v16 = vadd.f32 1.0, %v913_v14 }
 0x3e7   :  { %v329_v18 = vrot.slane %v915_v15, 2  ;;  %v324_v24 = vadd.f32 1.0, %v915_v15  ;;  %v490_v15 = vrot.slane %v1249_v35, 2 }
 0x3e8   :  { %v325_v17 = vmul.f32 0.5, %v323_v16  ;;  %v491_v16 = vrot.slane %v1251_v37, 2 }
 0x3e9   :  { %v326_v25 = vmul.f32 0.5, %v324_v24 }
 0x3ea   :  { %v331_v19 = vmul.f32 %v329_v18, %v325_v17  ;;  %v327_v21 = vmul.f32 %v325_v17, %v259_v39 }
 0x3ec   :  { %333 = vrot.lane.b32.xlu0 %v331_v19, %s1016_s1 }
 0x45e   :  { %v334_v22 = vpop.permute.xlu0 %333 }
 0x45f   :  { %v336_v23 = vadd.f32 %v334_v22, %v327_v21 }
 0x461   :  { %916 = vtanh.f32 %v336_v23 }
 0x467   :  { %v917_v26 = vpop.eup %916 }
 0x468   :  { %v338_v27 = vmul.f32 %v917_v26, %v326_v25 }
 0x46a   :  { %340 = vrot.lane.b32.xlu2 %v338_v27, %s1016_s1 }
 0x4c4   :  { %v341_v28 = vpop.permute.xlu2 %340 }
 0x4c5   :  { %875 = vmatmul.msk.f32.vlgmr.msrb.gmra.mxu0 %vm191_vm3, %v341_v28  ;;  %876 = vmatmul.msk.f32.vlgmr.msrb.gmra.mxu1 %vm191_vm3, %v341_v28 }
 0x4c6   :  { %658 = vmatpush.msrb.mxu0 %v1075_v54  ;;  %678 = vmatpush.msrb.mxu1 %v1077_v55 }
 0x4c8   :  { %659 = vmatpush.msrb.mxu0 %v1079_v56  ;;  %679 = vmatpush.msrb.mxu1 %v1083_v57 }
 0x4ca   :  { %660 = vmatpush.msrb.mxu0 %v1085_v58  ;;  %680 = vmatpush.msrb.mxu1 %v1087_v59 }
 0x4cc   :  { %661 = vmatpush.msrb.mxu0 %v1093_v60  ;;  %681 = vmatpush.msrb.mxu1 %v1095_v61 }
 0x4ce   :  { %662 = vmatpush.msrb.mxu0 %v1101_v62  ;;  %682 = vmatpush.msrb.mxu1 %v1103_v63 }
 0x4d0   :  { %663 = vmatpush.msrb.mxu0 %v1109_v0  ;;  %683 = vmatpush.msrb.mxu1 %v1111_v1 }
 0x4d2   :  { %664 = vmatpush.msrb.mxu0 %v1117_v2  ;;  %684 = vmatpush.msrb.mxu1 %v1119_v3 }
 0x4d4   :  { %665 = vmatpush.msrb.mxu0 %v1125_v4  ;;  %685 = vmatpush.msrb.mxu1 %v1127_v5 }
 0x542   :  { %v361_v29 = vpop.f32.mrf.mxu0  ;;  %v381_v30 = vpop.f32.mrf.mxu1 }
 0x543   :  { %v362_v31 = vadd.f32 %v361_v29, %v153_v43  ;;  %v382_v32 = vadd.f32 %v381_v30, %v154_v45 }
 0x545   :  { %v384_v33 = vmul.f32 0.5, %v362_v31  ;;  %v388_v34 = vrot.slane %v362_v31, 6  ;;  %v385_v36 = vmul.f32 0.5, %v382_v32  ;;  %v389_v38 = vrot.slane %v382_v32, 6 }
 0x547   :  { %v392_v39 = vsel %vm157_vm2, %v384_v33, %v388_v34  ;;  %v393_v42 = vsel %vm157_vm2, %v385_v36, %v389_v38 }
 0x548   :  { %918 = vtanh.f32 %v392_v39 }
 0x549   :  { %920 = vtanh.f32 %v393_v42 }
 0x54e   :  { %v919_v44 = vpop.eup %918 }
 0x54f   :  { %v921_v46 = vpop.eup %920  ;;  %v396_v47 = vadd.f32 1.0, %v919_v44 }
 0x550   :  { %v402_v49 = vrot.slane %v921_v46, 2  ;;  %v397_v50 = vadd.f32 1.0, %v921_v46 }
 0x551   :  { %v398_v48 = vmul.f32 0.5, %v396_v47  ;;  %v567_v47 = vrot.slane %v1249_v35, 4 }
 0x552   :  { %v399_v51 = vmul.f32 0.5, %v397_v50 }
 0x553   :  { %v404_v40 = vmul.f32 %v402_v49, %v398_v48  ;;  %v400_v41 = vmul.f32 %v398_v48, %v336_v23  ;;  %v568_v48 = vrot.slane %v1251_v37, 4 }
 0x555   :  { %406 = vrot.lane.b32.xlu0 %v404_v40, %s1016_s1 }
 0x5c7   :  { %v407_v43 = vpop.permute.xlu0 %406 }
 0x5c8   :  { %v409_v45 = vadd.f32 %v407_v43, %v400_v41 }
 0x5ca   :  { %922 = vtanh.f32 %v409_v45 }
 0x5d0   :  { %v923_v52 = vpop.eup %922 }
 0x5d1   :  { %v411_v53 = vmul.f32 %v923_v52, %v399_v51 }
 0x5d3   :  { %413 = vrot.lane.b32.xlu1 %v411_v53, %s1016_s1 }
 0x645   :  { %v414_v6 = vpop.permute.xlu1 %413 }
 0x646   :  { %877 = vmatmul.msk.f32.vlgmr.msra.gmra.mxu2 %vm191_vm3, %v414_v6  ;;  %878 = vmatmul.msk.f32.vlgmr.msra.gmra.mxu3 %vm191_vm3, %v414_v6 }
 0x647   :  { %736 = vmatpush.msra.mxu2 %v1075_v54  ;;  %756 = vmatpush.msra.mxu3 %v1077_v55 }
 0x649   :  { %737 = vmatpush.msra.mxu2 %v1079_v56  ;;  %757 = vmatpush.msra.mxu3 %v1083_v57 }
 0x64b   :  { %738 = vmatpush.msra.mxu2 %v1085_v58  ;;  %758 = vmatpush.msra.mxu3 %v1087_v59 }
 0x64d   :  { %739 = vmatpush.msra.mxu2 %v1093_v60  ;;  %759 = vmatpush.msra.mxu3 %v1095_v61 }
 0x64f   :  { %740 = vmatpush.msra.mxu2 %v1101_v62  ;;  %760 = vmatpush.msra.mxu3 %v1103_v63 }
 0x651   :  { %741 = vmatpush.msra.mxu2 %v1109_v0  ;;  %761 = vmatpush.msra.mxu3 %v1111_v1 }
 0x653   :  { %742 = vmatpush.msra.mxu2 %v1117_v2  ;;  %762 = vmatpush.msra.mxu3 %v1119_v3 }
 0x655   :  { %743 = vmatpush.msra.mxu2 %v1125_v4  ;;  %763 = vmatpush.msra.mxu3 %v1127_v5 }
 0x6c9   :  { %v434_v54 = vpop.f32.mrf.mxu2  ;;  %v454_v55 = vpop.f32.mrf.mxu3 }
 0x6ca   :  { %v435_v56 = vadd.f32 %v434_v54, %v1249_v35  ;;  %v455_v57 = vadd.f32 %v454_v55, %v1251_v37 }
 0x6cc   :  { %v457_v58 = vmul.f32 0.5, %v435_v56  ;;  %v461_v59 = vrot.slane %v435_v56, 6  ;;  %v458_v60 = vmul.f32 0.5, %v455_v57  ;;  %v462_v61 = vrot.slane %v455_v57, 6 }
 0x6ce   :  { %v465_v62 = vsel %vm157_vm2, %v457_v58, %v461_v59  ;;  %v466_v63 = vsel %vm157_vm2, %v458_v60, %v462_v61 }
 0x6cf   :  { %924 = vtanh.f32 %v465_v62 }
 0x6d0   :  { %926 = vtanh.f32 %v466_v63 }
 0x6d5   :  { %v925_v0 = vpop.eup %924 }
 0x6d6   :  { %v927_v1 = vpop.eup %926  ;;  %v469_v2 = vadd.f32 1.0, %v925_v0 }
 0x6d7   :  { %v475_v4 = vrot.slane %v927_v1, 2  ;;  %v470_v10 = vadd.f32 1.0, %v927_v1 }
 0x6d8   :  { %v471_v3 = vmul.f32 0.5, %v469_v2 }
 0x6d9   :  { %v472_v11 = vmul.f32 0.5, %v470_v10 }
 0x6da   :  { %v477_v5 = vmul.f32 %v475_v4, %v471_v3  ;;  %v473_v7 = vmul.f32 %v471_v3, %v409_v45  ;;  %v644_v4 = vrot.slane %v1249_v35, 6 }
 0x6dc   :  { %479 = vrot.lane.b32.xlu2 %v477_v5, %s1016_s1  ;;  %v645_v5 = vrot.slane %v1251_v37, 6 }
 0x736   :  { %v480_v8 = vpop.permute.xlu2 %479 }
 0x737   :  { %v482_v9 = vadd.f32 %v480_v8, %v473_v7 }
 0x739   :  { %928 = vtanh.f32 %v482_v9 }
 0x73f   :  { %v929_v12 = vpop.eup %928 }
 0x740   :  { %v484_v13 = vmul.f32 %v929_v12, %v472_v11 }
 0x742   :  { %486 = vrot.lane.b32.xlu0 %v484_v13, %s1016_s1 }
 0x7b4   :  { %v487_v14 = vpop.permute.xlu0 %486 }
 0x7b5   :  { %879 = vmatmul.msk.f32.vlgmr.msra.gmra.mxu0 %vm191_vm3, %v487_v14  ;;  %880 = vmatmul.msk.f32.vlgmr.msra.gmra.mxu1 %vm191_vm3, %v487_v14 }
 0x832   :  { %v513_v17 = vpop.f32.mrf.mxu0  ;;  %v533_v18 = vpop.f32.mrf.mxu1 }
 0x833   :  { %v514_v19 = vadd.f32 %v513_v17, %v490_v15  ;;  %v534_v20 = vadd.f32 %v533_v18, %v491_v16 }
 0x835   :  { %v536_v21 = vmul.f32 0.5, %v514_v19  ;;  %v540_v22 = vrot.slane %v514_v19, 6  ;;  %v537_v23 = vmul.f32 0.5, %v534_v20  ;;  %v541_v24 = vrot.slane %v534_v20, 6 }
 0x837   :  { %v544_v25 = vsel %vm157_vm2, %v536_v21, %v540_v22  ;;  %v545_v26 = vsel %vm157_vm2, %v537_v23, %v541_v24 }
 0x838   :  { %930 = vtanh.f32 %v544_v25 }
 0x839   :  { %932 = vtanh.f32 %v545_v26 }
 0x83e   :  { %v931_v27 = vpop.eup %930 }
 0x83f   :  { %v933_v28 = vpop.eup %932  ;;  %v548_v29 = vadd.f32 1.0, %v931_v27 }
 0x840   :  { %v554_v31 = vrot.slane %v933_v28, 2  ;;  %v549_v38 = vadd.f32 1.0, %v933_v28 }
 0x841   :  { %v550_v30 = vmul.f32 0.5, %v548_v29  ;;  %v145_v29 = vld [vmem:[#allocation2 + $0x180] ss:$8 sm:$0x3] }
 0x842   :  { %v551_v39 = vmul.f32 0.5, %v549_v38 }
 0x843   :  { %v556_v32 = vmul.f32 %v554_v31, %v550_v30  ;;  %v552_v33 = vmul.f32 %v550_v30, %v482_v9  ;;  %v719_v30 = vperm.slane %v145_v29, 0  ;;  %v720_v31 = vperm.slane %v145_v29, 1 }
 0x845   :  { %558 = vrot.lane.b32.xlu1 %v556_v32, %s1016_s1 }
 0x8b7   :  { %v559_v34 = vpop.permute.xlu1 %558 }
 0x8b8   :  { %v561_v36 = vadd.f32 %v559_v34, %v552_v33 }
 0x8ba   :  { %934 = vtanh.f32 %v561_v36 }
 0x8c0   :  { %v935_v42 = vpop.eup %934 }
 0x8c1   :  { %v563_v44 = vmul.f32 %v935_v42, %v551_v39 }
 0x8c3   :  { %565 = vrot.lane.b32.xlu2 %v563_v44, %s1016_s1 }
 0x91d   :  { %v566_v46 = vpop.permute.xlu2 %565 }
 0x91e   :  { %881 = vmatmul.msk.f32.vlgmr.msrb.gmra.mxu2 %vm191_vm3, %v566_v46  ;;  %882 = vmatmul.msk.f32.vlgmr.msrb.gmra.mxu3 %vm191_vm3, %v566_v46 }
 0x9a1   :  { %v590_v49 = vpop.f32.mrf.mxu2  ;;  %v610_v40 = vpop.f32.mrf.mxu3 }
 0x9a2   :  { %v591_v41 = vadd.f32 %v590_v49, %v567_v47  ;;  %v611_v43 = vadd.f32 %v610_v40, %v568_v48 }
 0x9a4   :  { %v613_v45 = vmul.f32 0.5, %v591_v41  ;;  %v617_v50 = vrot.slane %v591_v41, 6  ;;  %v614_v51 = vmul.f32 0.5, %v611_v43  ;;  %v618_v52 = vrot.slane %v611_v43, 6 }
 0x9a6   :  { %v621_v53 = vsel %vm157_vm2, %v613_v45, %v617_v50  ;;  %v622_v6 = vsel %vm157_vm2, %v614_v51, %v618_v52  ;;  %v799_v50 = vld [vmem:[%s1340_s2 + $0x18] sm:$0xff]  ;;  %v798_v51 = vld [vmem:[%s1340_s2 + $0x10] sm:$0xff]  ;;  %v797_v52 = vld [vmem:[%s1340_s2 + $0x8] sm:$0xff] }
 0x9a7   :  { %936 = vtanh.f32 %v621_v53  ;;  %820 = vmatpush.msra.mxu0 %v799_v50  ;;  %v796_v53 = vld [vmem:[%s1340_s2] sm:$0xff] }
 0x9a8   :  { %938 = vtanh.f32 %v622_v6 }
 0x9a9   :  { %821 = vmatpush.msra.mxu0 %v798_v51 }
 0x9ab   :  { %822 = vmatpush.msra.mxu0 %v797_v52 }
 0x9ad   :  { %v937_v54 = vpop.eup %936  ;;  %823 = vmatpush.msra.mxu0 %v796_v53 }
 0x9ae   :  { %v939_v55 = vpop.eup %938  ;;  %v625_v56 = vadd.f32 1.0, %v937_v54 }
 0x9af   :  { %v631_v58 = vrot.slane %v939_v55, 2  ;;  %v626_v63 = vadd.f32 1.0, %v939_v55 }
 0x9b0   :  { %v627_v57 = vmul.f32 0.5, %v625_v56 }
 0x9b1   :  { %v628_v0 = vmul.f32 0.5, %v626_v63 }
 0x9b2   :  { %v633_v59 = vmul.f32 %v631_v58, %v627_v57  ;;  %v629_v60 = vmul.f32 %v627_v57, %v561_v36 }
 0x9b4   :  { %635 = vrot.lane.b32.xlu0 %v633_v59, %s1016_s1 }
 0xa26   :  { %v636_v61 = vpop.permute.xlu0 %635 }
 0xa27   :  { %v638_v62 = vadd.f32 %v636_v61, %v629_v60  ;;  %v899_v61 = vld [vmem:[%s1340_s2 + $0x20] ss:$0 sm:$0xff]  ;;  %s1018_s2 = smov [#allocation5]  }
 0xa29   :  { %940 = vtanh.f32 %v638_v62 }
 0xa2f   :  { %v941_v1 = vpop.eup %940 }
 0xa30   :  { %v640_v2 = vmul.f32 %v941_v1, %v628_v0 }
 0xa32   :  { %642 = vrot.lane.b32.xlu1 %v640_v2, %s1016_s1 }
 0xaa4   :  { %v643_v3 = vpop.permute.xlu1 %642 }
 0xaa5   :  { %883 = vmatmul.msk.f32.vlgmr.msrb.gmra.mxu0 %vm191_vm3, %v643_v3  ;;  %884 = vmatmul.msk.f32.vlgmr.msrb.gmra.mxu1 %vm191_vm3, %v643_v3 }
 0xb22   :  { %v667_v7 = vpop.f32.mrf.mxu0  ;;  %v687_v8 = vpop.f32.mrf.mxu1 }
 0xb23   :  { %v668_v9 = vadd.f32 %v667_v7, %v644_v4  ;;  %v688_v10 = vadd.f32 %v687_v8, %v645_v5 }
 0xb25   :  { %v690_v11 = vmul.f32 0.5, %v668_v9  ;;  %v694_v12 = vrot.slane %v668_v9, 6  ;;  %v691_v13 = vmul.f32 0.5, %v688_v10  ;;  %v695_v14 = vrot.slane %v688_v10, 6 }
 0xb27   :  { %v698_v15 = vsel %vm157_vm2, %v690_v11, %v694_v12  ;;  %v699_v16 = vsel %vm157_vm2, %v691_v13, %v695_v14 }
 0xb28   :  { %942 = vtanh.f32 %v698_v15 }
 0xb29   :  { %944 = vtanh.f32 %v699_v16 }
 0xb2e   :  { %v943_v17 = vpop.eup %942 }
 0xb2f   :  { %v945_v18 = vpop.eup %944  ;;  %v702_v19 = vadd.f32 1.0, %v943_v17 }
 0xb30   :  { %v708_v20 = vrot.slane %v945_v18, 2  ;;  %v703_v24 = vadd.f32 1.0, %v945_v18 }
 0xb31   :  { %v704_v35 = vmul.f32 0.5, %v702_v19 }
 0xb32   :  { %v705_v25 = vmul.f32 0.5, %v703_v24 }
 0xb33   :  { %v710_v37 = vmul.f32 %v708_v20, %v704_v35  ;;  %v706_v21 = vmul.f32 %v704_v35, %v638_v62  ;;  %v828_v62 = vld [vmem:[%s1341_s3] sm:$0x3]  ;;  %s852_s3 = sshll.u32 %s1018_s2, 4  ;;  %s853_s3 = int_to_ptr.vmem [resolvable:$true] %s852_s3 }
 0xb34   :  { %vm829_vm6 = vcmp.lt.f32.partialorder %v828_v62, 0.2 }
 0xb35   :  { %712 = vrot.lane.b32.xlu2 %v710_v37, %s1016_s1 }
 0xb8f   :  { %v713_v22 = vpop.permute.xlu2 %712 }
 0xb90   :  { %v715_v23 = vadd.f32 %v713_v22, %v706_v21 }
 0xb92   :  { %946 = vtanh.f32 %v715_v23 }
 0xb98   :  { %v947_v26 = vpop.eup %946 }
 0xb99   :  { %v717_v27 = vmul.f32 %v947_v26, %v705_v25 }
 0xb9b   :  { %724 = vrot.lane.b32.xlu0 %v717_v27, %s1016_s1 }
 0xc0d   :  { %v725_v28 = vpop.permute.xlu0 %724 }
 0xc0e   :  { %885 = vmatmul.msk.f32.vlgmr.msra.gmra.mxu2 %vm191_vm3, %v725_v28  ;;  %886 = vmatmul.msk.f32.vlgmr.msra.gmra.mxu3 %vm191_vm3, %v725_v28 }
 0xc91   :  { %v745_v32 = vpop.f32.mrf.mxu2  ;;  %v765_v33 = vpop.f32.mrf.mxu3 }
 0xc92   :  { %v746_v34 = vadd.f32 %v745_v32, %v719_v30  ;;  %v766_v36 = vadd.f32 %v765_v33, %v720_v31 }
 0xc94   :  { %v768_v38 = vmul.f32 0.5, %v746_v34  ;;  %v772_v39 = vrot.slane %v746_v34, 6  ;;  %v769_v42 = vmul.f32 0.5, %v766_v36  ;;  %v773_v44 = vrot.slane %v766_v36, 6 }
 0xc96   :  { %v776_v46 = vsel %vm157_vm2, %v768_v38, %v772_v39  ;;  %v777_v47 = vsel %vm157_vm2, %v769_v42, %v773_v44 }
 0xc97   :  { %948 = vtanh.f32 %v776_v46 }
 0xc98   :  { %950 = vtanh.f32 %v777_v47 }
 0xc9d   :  { %v949_v48 = vpop.eup %948 }
 0xc9e   :  { %v951_v49 = vpop.eup %950  ;;  %v780_v40 = vadd.f32 1.0, %v949_v48 }
 0xc9f   :  { %v786_v43 = vrot.slane %v951_v49, 2  ;;  %v781_v56 = vadd.f32 1.0, %v951_v49 }
 0xca0   :  { %v782_v41 = vmul.f32 0.5, %v780_v40 }
 0xca1   :  { %v783_v57 = vmul.f32 0.5, %v781_v56 }
 0xca2   :  { %v788_v45 = vmul.f32 %v786_v43, %v782_v41  ;;  %v784_v6 = vmul.f32 %v782_v41, %v715_v23 }
 0xca4   :  { %790 = vrot.lane.b32.xlu1 %v788_v45, %s1016_s1 }
 0xd16   :  { %v791_v54 = vpop.permute.xlu1 %790 }
 0xd17   :  { %v793_v55 = vadd.f32 %v791_v54, %v784_v6 }
 0xd19   :  { %952 = vtanh.f32 %v793_v55 }
 0xd1f   :  { %v953_v58 = vpop.eup %952 }
 0xd20   :  { %v795_v59 = vmul.f32 %v953_v58, %v783_v57 }
 0xd22   :  { %803 = vrot.lane.b32.xlu2 %v795_v59, %s1017_s7 }
 0xd7c   :  { %v804_v60 = vpop.permute.xlu2 %803 }
 0xd7d   :  { %887 = vmatmul.msk.f32.vlgmr.msra.gmra.mxu0 %vm805_vm5, %v804_v60 }
 0xdfa   :  { %v825_v63 = vpop.f32.mrf.mxu0 }
 0xdfb   :  { %v826_v0 = vadd.f32 %v899_v61, %v825_v63 }
 0xdfd   :  { %v830_v1 = vmul.f32 5.0, %v826_v0 }
 0xdff   :  { %v831_v2 = vsel %vm829_vm6, %v830_v1, 0.0 }
 0xe00   :  { %v833_v3 = vsel %vm832_vm7, %v831_v2, -inf }
 0xe01   :  { %834 = vmax.xlane.f32.xlu0 %v833_v3 }
 0xe74   :  { %v835_v4 = vpop.xlane.xlu0 %834 }
 0xe75   :  { %v836_v5 = vsub.f32 %v831_v2, %v835_v4 }
 0xe77   :  { %v837_v7 = vmul.f32 1.442695, %v836_v5 }
 0xe79   :  { %954 = vpow2.f32 %v837_v7 }
 0xe7f   :  { %v955_v8 = vpop.eup %954 }
 0xe80   :  { %v839_v9 = vsel %vm832_vm7, %v955_v8, 0.0 }
 0xe81   :  { %840 = vadd.xlane.f32.xlu1 %v839_v9 }
 0xef4   :  { %v841_v10 = vpop.xlane.xlu1 %840 }
 0xef5   :  { %956 = vlog2.f32 %v841_v10 }
 0xefb   :  { %v957_v11 = vpop.eup %956 }
 0xefc   :  { %v843_v12 = vmul.f32 0.6931472, %v957_v11 }
 0xefe   :  { %v844_v13 = vadd.f32 %v843_v12, %v835_v4 }
 0xf00   :  { %v845_v14 = vsub.f32 %v831_v2, %v844_v13 }
 0xf02   :  { %846 = vst.msk [vmem:[#allocation5] sm:$0x3] %vm832_vm7, %v845_v14 }
 0xf03   :  { %857 = dma.vmem_to_hbm [thread:$0]  %s853_s3, 32, %s855_s14, [#allocation4]  }
 0xf04   :  { %1008 = dma.done.wait [#allocation4], 32  }
 0xf05   :  { %1009 = vsyncadd [#allocation4], 4294967264 }
 0xf06   :  { %862 = vsyncpa [#allocation3], 1 }
 0xf07   :  { %863 = vsyncpa [#allocation4], 1 }

</bundles_post_ra>
